<compile_context>
chip_gen: v6e
topology: v6e:2x2x1
jax: 0.10.0
libtpu: 0.0.40
codegen_flags: <defaults>
</compile_context>

<pallas_src>
import functools

import jax
import jax.numpy as jnp
from jax.experimental import pallas as pl
from jax.experimental.pallas import tpu as pltpu


def _fused_flow_kernel(x_ref, w1_ref, b1_ref, w2_ref, b2_ref,
                       z_ref, ld_ref, *, num_blocks, dim):
    """All coupling blocks (normalizing direction); batch on the lane axis.

    Shapes inside the kernel (TB = batch tile on lanes):
      x_ref, z_ref : (D, TB)        transposed activations
      w1_ref       : (NB, 2H, D)    [W1s | W1t]^T          (fused first layer)
      b1_ref       : (NB, 2H, 1)
      w2_ref       : (NB, 2D, 2H)   blockdiag(W2s, W2t)^T  (fused second layer)
      b2_ref       : (NB, 2D, 1)
      ld_ref       : (NB, TB)       per-block -sum(s) over features
    """
    D = dim
    z = x_ref[...]                                        # (D, TB) f32

    # Checkerboard masks built in-kernel (no mask inputs), hoisted out of the
    # block loop.  Feature axis = sublanes, batch axis = lanes.
    feat = jax.lax.broadcasted_iota(jnp.int32, (D, 1), 0)
    mask_a = (feat % 2).astype(jnp.float32)               # torch: arange(D) % 2
    mask_b = 1.0 - mask_a

    for c in range(num_blocks):                           # unrolled; NB is small
        mask = mask_a if (c % 2 == 0) else mask_b
        inv_mask = mask_b if (c % 2 == 0) else mask_a

        z_m = z * mask                                    # (D, TB)

        # Fused scale/translate first layer: one MXU push instead of two.
        h = jnp.tanh(
            jnp.dot(w1_ref[c], z_m, preferred_element_type=jnp.float32)
            + b1_ref[c])                                  # (2H, TB)

        # Fused block-diagonal second layer: rows [:D] -> s, rows [D:] -> t
        # (zero off-diagonal blocks keep s and t independent).
        st = (jnp.dot(w2_ref[c], h, preferred_element_type=jnp.float32)
              + b2_ref[c])                                # (2D, TB)

        s = st[:D, :] * inv_mask                          # (D, TB)
        t = st[D:, :] * inv_mask

        # Inverse affine coupling + log|det J| (f32 elementwise: v5e-safe).
        z = z_m + inv_mask * (z - t) * jnp.exp(-s)
        ld_ref[pl.ds(c, 1), :] = -jnp.sum(s, axis=0, keepdims=True)

    z_ref[...] = z


def pack_flow_params(block_params):
    """Fuse + stack per-block weights once so they stay VMEM-resident."""
    D, H = block_params[0]["w1s"].shape
    zeros_hd = jnp.zeros((H, D), jnp.float32)
    w1 = jnp.stack([jnp.concatenate([p["w1s"], p["w1t"]], axis=1).T
                    for p in block_params])                        # (NB, 2H, D)
    b1 = jnp.stack([jnp.concatenate([p["b1s"], p["b1t"]], axis=1).T
                    for p in block_params])                        # (NB, 2H, 1)
    w2 = jnp.stack([jnp.concatenate(
        [jnp.concatenate([p["w2s"], zeros_hd], axis=1),
         jnp.concatenate([zeros_hd, p["w2t"]], axis=1)], axis=0).T
                    for p in block_params])                        # (NB, 2D, 2H)
    b2 = jnp.stack([jnp.concatenate([p["b2s"], p["b2t"]], axis=1).T
                    for p in block_params])                        # (NB, 2D, 1)
    return {"w1": w1, "b1": b1, "w2": w2, "b2": b2}


def masked_normalizing_flow_forward(x, packed, *, tile_b=512):
    """MaskedNormalizingFlow.forward: entire bijector chain in one pallas_call."""
    B, D = x.shape
    NB, H2, _ = packed["w1"].shape          # H2 = 2*hidden

    x_t = x.T                               # (D, B): batch -> lane axis

    if B <= tile_b:
        TB, Bp = B, B
    else:
        TB = tile_b
        Bp = ((B + TB - 1) // TB) * TB
        if Bp != B:
            x_t = jnp.pad(x_t, ((0, 0), (0, Bp - B)))
    grid = (Bp // TB,)

    kernel = functools.partial(_fused_flow_kernel, num_blocks=NB, dim=D)
    resident = lambda i: (0, 0, 0)          # weights: constant block, stay in VMEM

    z_t, ld = pl.pallas_call(
        kernel,
        grid=grid,
        in_specs=[
            pl.BlockSpec((D, TB), lambda i: (0, i)),       # x tile
            pl.BlockSpec((NB, H2, D), resident),           # fused W1
            pl.BlockSpec((NB, H2, 1), resident),           # fused b1
            pl.BlockSpec((NB, 2 * D, H2), resident),       # fused (blockdiag) W2
            pl.BlockSpec((NB, 2 * D, 1), resident),        # fused b2
        ],
        out_specs=[
            pl.BlockSpec((D, TB), lambda i: (0, i)),       # z tile (lane-dense)
            pl.BlockSpec((NB, TB), lambda i: (0, i)),      # all log-dets, one store
        ],
        out_shape=[
            jax.ShapeDtypeStruct((D, Bp), jnp.float32),
            jax.ShapeDtypeStruct((NB, Bp), jnp.float32),
        ],
        compiler_params=pltpu.CompilerParams(
            dimension_semantics=("parallel",)),            # shard batch tiles (v7x: 2 TCs)
    )(x_t, packed["w1"], packed["b1"], packed["w2"], packed["b2"])

    z = z_t[:, :B].T
    log_det = [ld[c, :B] for c in range(NB)]               # list, matches torch forward
    return z, log_det


# ----------------------------- helpers / reference -----------------------------

def checkerboard_masks(dim):
    mask1 = (jnp.arange(dim, dtype=jnp.float32) % 2.0).reshape(1, dim)
    return [mask1, 1.0 - mask1]


def init_coupling_params(key, dim, hidden):
    ks = jax.random.split(key, 4)
    scale = 0.1
    return {
        "w1s": scale * jax.random.normal(ks[0], (dim, hidden), jnp.float32),
        "b1s": jnp.zeros((1, hidden), jnp.float32),
        "w2s": scale * jax.random.normal(ks[1], (hidden, dim), jnp.float32),
        "b2s": jnp.zeros((1, dim), jnp.float32),
        "w1t": scale * jax.random.normal(ks[2], (dim, hidden), jnp.float32),
        "b1t": jnp.zeros((1, hidden), jnp.float32),
        "w2t": scale * jax.random.normal(ks[3], (hidden, dim), jnp.float32),
        "b2t": jnp.zeros((1, dim), jnp.float32),
    }


def _flow_reference(x, block_params, masks):
    """Pure-JAX reference of the torch forward (per-block inverse coupling)."""
    hi = jax.lax.Precision.HIGHEST
    z, log_det = x, []
    for c, p in enumerate(block_params):
        mask = masks[0] if c % 2 == 0 else masks[1]
        inv = 1.0 - mask
        z_m = z * mask
        h_s = jnp.tanh(jnp.dot(z_m, p["w1s"], precision=hi) + p["b1s"])
        s = (jnp.dot(h_s, p["w2s"], precision=hi) + p["b2s"]) * inv
        h_t = jnp.tanh(jnp.dot(z_m, p["w1t"], precision=hi) + p["b1t"])
        t = (jnp.dot(h_t, p["w2t"], precision=hi) + p["b2t"]) * inv
        z = z_m + inv * (z - t) * jnp.exp(-s)
        log_det.append(-jnp.sum(s, axis=1))
    return z, log_det


if __name__ == "__main__":
    B, D, H = 256, 8, 32          # batch, input dim, hidden width
    NUM_BLOCKS = 4                # must be even (see _validate_blocks)

    key = jax.random.PRNGKey(0)
    k_x, *k_blocks = jax.random.split(key, NUM_BLOCKS + 1)

    x = jax.random.normal(k_x, (B, D), jnp.float32)
    block_params = [init_coupling_params(k, D, H) for k in k_blocks]
    packed = pack_flow_params(block_params)

    # TODO(synk): the base-distribution log_prob / sample path of NormalizingFlow
    # is plain JAX glue and not part of the kernel hot path.

    z, log_det = masked_normalizing_flow_forward(x, packed, tile_b=128)
    z = jax.block_until_ready(z)
    log_det = [jax.block_until_ready(ld) for ld in log_det]

    # Correctness check against the pure-JAX reference of the torch forward.
    z_exp, ld_exp = _flow_reference(x, block_params, checkerboard_masks(D))
    assert jnp.allclose(z, z_exp, rtol=1e-2, atol=1e-2)
    for got, exp in zip(log_det, ld_exp):
        assert jnp.allclose(got, exp, rtol=1e-2, atol=1e-2)

    assert z.shape == (B, D)
    assert all(ld.shape == (B,) for ld in log_det)
    assert len(log_det) == NUM_BLOCKS
    print("KERNEL_OK")
</pallas_src>

<mosaic_0001>
module attributes {stable_mosaic.version = 11 : i64} {
  func.func @_fused_flow_kernel(%arg0: i32, %arg1: memref<8x128xf32, #tpu.memory_space<vmem>>, %arg2: memref<4x64x8xf32, #tpu.memory_space<vmem>>, %arg3: memref<4x64x1xf32, #tpu.memory_space<vmem>>, %arg4: memref<4x16x64xf32, #tpu.memory_space<vmem>>, %arg5: memref<4x16x1xf32, #tpu.memory_space<vmem>>, %arg6: memref<8x128xf32, #tpu.memory_space<vmem>>, %arg7: memref<4x128xf32, #tpu.memory_space<vmem>>) attributes {dimension_semantics = [#tpu.dimension_semantics<parallel>], iteration_bounds = array<i64: 2>, scalar_prefetch = 0 : i64, scratch_operands = 0 : i64, tpu.core_type = #tpu.core_type<tc>, window_params = [{transform_indices = @transform_0, window_bounds = array<i64: 8, 128>}, {pipeline_mode = #tpu.pipeline_mode<synchronous>, transform_indices = @transform_1, window_bounds = array<i64: 4, 64, 8>}, {pipeline_mode = #tpu.pipeline_mode<synchronous>, transform_indices = @transform_2, window_bounds = array<i64: 4, 64, 1>}, {pipeline_mode = #tpu.pipeline_mode<synchronous>, transform_indices = @transform_3, window_bounds = array<i64: 4, 16, 64>}, {pipeline_mode = #tpu.pipeline_mode<synchronous>, transform_indices = @transform_4, window_bounds = array<i64: 4, 16, 1>}, {transform_indices = @transform_5, window_bounds = array<i64: 8, 128>}, {transform_indices = @transform_6, window_bounds = array<i64: 4, 128>}]} {
    %c0 = arith.constant 0 : index
    %c0_0 = arith.constant 0 : index
    %0 = vector.load %arg1[%c0, %c0_0] : memref<8x128xf32, #tpu.memory_space<vmem>>, vector<8x128xf32>
    %1 = tpu.iota {dimensions = array<i32: 0>} : vector<8x1xi32>
    %c2_i32 = arith.constant 2 : i32
    %c0_i32 = arith.constant 0 : i32
    %2 = arith.cmpi eq, %c2_i32, %c0_i32 : i32
    %c1_i32 = arith.constant 1 : i32
    %3 = arith.select %2, %c1_i32, %c2_i32 : i32
    %4 = vector.broadcast %3 : i32 to vector<8x1xi32>
    %5 = arith.remsi %1, %4 : vector<8x1xi32>
    %c0_i32_1 = arith.constant 0 : i32
    %6 = vector.broadcast %c0_i32_1 : i32 to vector<8x1xi32>
    %7 = arith.cmpi ne, %5, %6 : vector<8x1xi32>
    %c0_i32_2 = arith.constant 0 : i32
    %8 = vector.broadcast %c0_i32_2 : i32 to vector<8x1xi32>
    %9 = arith.cmpi slt, %5, %8 : vector<8x1xi32>
    %c0_i32_3 = arith.constant 0 : i32
    %10 = arith.cmpi slt, %3, %c0_i32_3 : i32
    %11 = vector.broadcast %10 : i1 to vector<8x1xi1>
    %12 = vector.broadcast %11 : vector<8x1xi1> to vector<8x1xi1>
    %13 = arith.xori %9, %12 : vector<8x1xi1>
    %14 = arith.andi %13, %7 : vector<8x1xi1>
    %15 = vector.broadcast %3 : i32 to vector<8x1xi32>
    %16 = arith.addi %5, %15 : vector<8x1xi32>
    %17 = arith.select %14, %16, %5 : vector<8x1xi1>, vector<8x1xi32>
    %18 = arith.sitofp %17 : vector<8x1xi32> to vector<8x1xf32>
    %cst = arith.constant 1.000000e+00 : f32
    %19 = vector.broadcast %cst : f32 to vector<8x1xf32>
    %20 = arith.subf %19, %18 : vector<8x1xf32>
    %21 = vector.broadcast %18 : vector<8x1xf32> to vector<8x128xf32>
    %22 = arith.mulf %0, %21 : vector<8x128xf32>
    %c0_4 = arith.constant 0 : index
    %c0_5 = arith.constant 0 : index
    %c0_6 = arith.constant 0 : index
    %23 = vector.load %arg2[%c0_4, %c0_5, %c0_6] : memref<4x64x8xf32, #tpu.memory_space<vmem>>, vector<1x64x8xf32>
    %24 = vector.shape_cast %23 : vector<1x64x8xf32> to vector<64x8xf32>
    %cst_7 = arith.constant dense<0.000000e+00> : vector<64x128xf32>
    %25 = tpu.matmul %24, %22, %cst_7 {dimension_numbers = #tpu.dot_dimension_numbers<[1], [0], [0], [1], [0, 0, 1, 1], [], []>} : vector<64x8xf32>, vector<8x128xf32>, vector<64x128xf32> -> vector<64x128xf32>
    %c0_8 = arith.constant 0 : index
    %c0_9 = arith.constant 0 : index
    %c0_10 = arith.constant 0 : index
    %26 = vector.load %arg3[%c0_8, %c0_9, %c0_10] : memref<4x64x1xf32, #tpu.memory_space<vmem>>, vector<1x64x1xf32>
    %27 = vector.shape_cast %26 : vector<1x64x1xf32> to vector<64x1xf32>
    %28 = vector.broadcast %27 : vector<64x1xf32> to vector<64x128xf32>
    %29 = arith.addf %25, %28 : vector<64x128xf32>
    %30 = math.tanh %29 : vector<64x128xf32>
    %c0_11 = arith.constant 0 : index
    %c0_12 = arith.constant 0 : index
    %c0_13 = arith.constant 0 : index
    %31 = vector.load %arg4[%c0_11, %c0_12, %c0_13] : memref<4x16x64xf32, #tpu.memory_space<vmem>>, vector<1x16x64xf32>
    %32 = vector.shape_cast %31 : vector<1x16x64xf32> to vector<16x64xf32>
    %cst_14 = arith.constant dense<0.000000e+00> : vector<16x128xf32>
    %33 = tpu.matmul %32, %30, %cst_14 {dimension_numbers = #tpu.dot_dimension_numbers<[1], [0], [0], [1], [0, 0, 1, 1], [], []>} : vector<16x64xf32>, vector<64x128xf32>, vector<16x128xf32> -> vector<16x128xf32>
    %c0_15 = arith.constant 0 : index
    %c0_16 = arith.constant 0 : index
    %c0_17 = arith.constant 0 : index
    %34 = vector.load %arg5[%c0_15, %c0_16, %c0_17] : memref<4x16x1xf32, #tpu.memory_space<vmem>>, vector<1x16x1xf32>
    %35 = vector.shape_cast %34 : vector<1x16x1xf32> to vector<16x1xf32>
    %36 = vector.broadcast %35 : vector<16x1xf32> to vector<16x128xf32>
    %37 = arith.addf %33, %36 : vector<16x128xf32>
    %38 = vector.extract_strided_slice %37 {offsets = [0, 0], sizes = [8, 128], strides = [1, 1]} : vector<16x128xf32> to vector<8x128xf32>
    %39 = vector.broadcast %20 : vector<8x1xf32> to vector<8x128xf32>
    %40 = arith.mulf %38, %39 : vector<8x128xf32>
    %41 = vector.extract_strided_slice %37 {offsets = [8, 0], sizes = [8, 128], strides = [1, 1]} : vector<16x128xf32> to vector<8x128xf32>
    %42 = vector.broadcast %20 : vector<8x1xf32> to vector<8x128xf32>
    %43 = arith.mulf %41, %42 : vector<8x128xf32>
    %44 = arith.subf %0, %43 : vector<8x128xf32>
    %45 = vector.broadcast %20 : vector<8x1xf32> to vector<8x128xf32>
    %46 = arith.mulf %45, %44 : vector<8x128xf32>
    %cst_18 = arith.constant 0.000000e+00 : f32
    %47 = vector.broadcast %cst_18 : f32 to vector<8x128xf32>
    %48 = arith.subf %47, %40 : vector<8x128xf32>
    %49 = math.exp %48 : vector<8x128xf32>
    %50 = arith.mulf %46, %49 : vector<8x128xf32>
    %51 = arith.addf %22, %50 : vector<8x128xf32>
    %cst_19 = arith.constant dense<0.000000e+00> : vector<128xf32>
    %52 = vector.multi_reduction <add>, %40, %cst_19 [0] : vector<8x128xf32> to vector<128xf32>
    %53 = vector.shape_cast %52 : vector<128xf32> to vector<1x128xf32>
    %cst_20 = arith.constant 0.000000e+00 : f32
    %54 = vector.broadcast %cst_20 : f32 to vector<1x128xf32>
    %55 = arith.subf %54, %53 : vector<1x128xf32>
    %c0_21 = arith.constant 0 : index
    %c0_22 = arith.constant 0 : index
    %56 = vector.load %arg7[%c0_21, %c0_22] : memref<4x128xf32, #tpu.memory_space<vmem>>, vector<1x128xf32>
    tpu.vector_store %arg7[%c0_21, %c0_22], %55 {strides = array<i32>} : memref<4x128xf32, #tpu.memory_space<vmem>>, vector<1x128xf32>,
    %57 = vector.broadcast %20 : vector<8x1xf32> to vector<8x128xf32>
    %58 = arith.mulf %51, %57 : vector<8x128xf32>
    %c1 = arith.constant 1 : index
    %c0_23 = arith.constant 0 : index
    %c0_24 = arith.constant 0 : index
    %59 = vector.load %arg2[%c1, %c0_23, %c0_24] : memref<4x64x8xf32, #tpu.memory_space<vmem>>, vector<1x64x8xf32>
    %60 = vector.shape_cast %59 : vector<1x64x8xf32> to vector<64x8xf32>
    %cst_25 = arith.constant dense<0.000000e+00> : vector<64x128xf32>
    %61 = tpu.matmul %60, %58, %cst_25 {dimension_numbers = #tpu.dot_dimension_numbers<[1], [0], [0], [1], [0, 0, 1, 1], [], []>} : vector<64x8xf32>, vector<8x128xf32>, vector<64x128xf32> -> vector<64x128xf32>
    %c1_26 = arith.constant 1 : index
    %c0_27 = arith.constant 0 : index
    %c0_28 = arith.constant 0 : index
    %62 = vector.load %arg3[%c1_26, %c0_27, %c0_28] : memref<4x64x1xf32, #tpu.memory_space<vmem>>, vector<1x64x1xf32>
    %63 = vector.shape_cast %62 : vector<1x64x1xf32> to vector<64x1xf32>
    %64 = vector.broadcast %63 : vector<64x1xf32> to vector<64x128xf32>
    %65 = arith.addf %61, %64 : vector<64x128xf32>
    %66 = math.tanh %65 : vector<64x128xf32>
    %c1_29 = arith.constant 1 : index
    %c0_30 = arith.constant 0 : index
    %c0_31 = arith.constant 0 : index
    %67 = vector.load %arg4[%c1_29, %c0_30, %c0_31] : memref<4x16x64xf32, #tpu.memory_space<vmem>>, vector<1x16x64xf32>
    %68 = vector.shape_cast %67 : vector<1x16x64xf32> to vector<16x64xf32>
    %cst_32 = arith.constant dense<0.000000e+00> : vector<16x128xf32>
    %69 = tpu.matmul %68, %66, %cst_32 {dimension_numbers = #tpu.dot_dimension_numbers<[1], [0], [0], [1], [0, 0, 1, 1], [], []>} : vector<16x64xf32>, vector<64x128xf32>, vector<16x128xf32> -> vector<16x128xf32>
    %c1_33 = arith.constant 1 : index
    %c0_34 = arith.constant 0 : index
    %c0_35 = arith.constant 0 : index
    %70 = vector.load %arg5[%c1_33, %c0_34, %c0_35] : memref<4x16x1xf32, #tpu.memory_space<vmem>>, vector<1x16x1xf32>
    %71 = vector.shape_cast %70 : vector<1x16x1xf32> to vector<16x1xf32>
    %72 = vector.broadcast %71 : vector<16x1xf32> to vector<16x128xf32>
    %73 = arith.addf %69, %72 : vector<16x128xf32>
    %74 = vector.extract_strided_slice %73 {offsets = [0, 0], sizes = [8, 128], strides = [1, 1]} : vector<16x128xf32> to vector<8x128xf32>
    %75 = vector.broadcast %18 : vector<8x1xf32> to vector<8x128xf32>
    %76 = arith.mulf %74, %75 : vector<8x128xf32>
    %77 = vector.extract_strided_slice %73 {offsets = [8, 0], sizes = [8, 128], strides = [1, 1]} : vector<16x128xf32> to vector<8x128xf32>
    %78 = vector.broadcast %18 : vector<8x1xf32> to vector<8x128xf32>
    %79 = arith.mulf %77, %78 : vector<8x128xf32>
    %80 = arith.subf %51, %79 : vector<8x128xf32>
    %81 = vector.broadcast %18 : vector<8x1xf32> to vector<8x128xf32>
    %82 = arith.mulf %81, %80 : vector<8x128xf32>
    %cst_36 = arith.constant 0.000000e+00 : f32
    %83 = vector.broadcast %cst_36 : f32 to vector<8x128xf32>
    %84 = arith.subf %83, %76 : vector<8x128xf32>
    %85 = math.exp %84 : vector<8x128xf32>
    %86 = arith.mulf %82, %85 : vector<8x128xf32>
    %87 = arith.addf %58, %86 : vector<8x128xf32>
    %cst_37 = arith.constant dense<0.000000e+00> : vector<128xf32>
    %88 = vector.multi_reduction <add>, %76, %cst_37 [0] : vector<8x128xf32> to vector<128xf32>
    %89 = vector.shape_cast %88 : vector<128xf32> to vector<1x128xf32>
    %cst_38 = arith.constant 0.000000e+00 : f32
    %90 = vector.broadcast %cst_38 : f32 to vector<1x128xf32>
    %91 = arith.subf %90, %89 : vector<1x128xf32>
    %c1_39 = arith.constant 1 : index
    %c0_40 = arith.constant 0 : index
    %92 = vector.load %arg7[%c1_39, %c0_40] : memref<4x128xf32, #tpu.memory_space<vmem>>, vector<1x128xf32>
    tpu.vector_store %arg7[%c1_39, %c0_40], %91 {strides = array<i32>} : memref<4x128xf32, #tpu.memory_space<vmem>>, vector<1x128xf32>,
    %93 = vector.broadcast %18 : vector<8x1xf32> to vector<8x128xf32>
    %94 = arith.mulf %87, %93 : vector<8x128xf32>
    %c2 = arith.constant 2 : index
    %c0_41 = arith.constant 0 : index
    %c0_42 = arith.constant 0 : index
    %95 = vector.load %arg2[%c2, %c0_41, %c0_42] : memref<4x64x8xf32, #tpu.memory_space<vmem>>, vector<1x64x8xf32>
    %96 = vector.shape_cast %95 : vector<1x64x8xf32> to vector<64x8xf32>
    %cst_43 = arith.constant dense<0.000000e+00> : vector<64x128xf32>
    %97 = tpu.matmul %96, %94, %cst_43 {dimension_numbers = #tpu.dot_dimension_numbers<[1], [0], [0], [1], [0, 0, 1, 1], [], []>} : vector<64x8xf32>, vector<8x128xf32>, vector<64x128xf32> -> vector<64x128xf32>
    %c2_44 = arith.constant 2 : index
    %c0_45 = arith.constant 0 : index
    %c0_46 = arith.constant 0 : index
    %98 = vector.load %arg3[%c2_44, %c0_45, %c0_46] : memref<4x64x1xf32, #tpu.memory_space<vmem>>, vector<1x64x1xf32>
    %99 = vector.shape_cast %98 : vector<1x64x1xf32> to vector<64x1xf32>
    %100 = vector.broadcast %99 : vector<64x1xf32> to vector<64x128xf32>
    %101 = arith.addf %97, %100 : vector<64x128xf32>
    %102 = math.tanh %101 : vector<64x128xf32>
    %c2_47 = arith.constant 2 : index
    %c0_48 = arith.constant 0 : index
    %c0_49 = arith.constant 0 : index
    %103 = vector.load %arg4[%c2_47, %c0_48, %c0_49] : memref<4x16x64xf32, #tpu.memory_space<vmem>>, vector<1x16x64xf32>
    %104 = vector.shape_cast %103 : vector<1x16x64xf32> to vector<16x64xf32>
    %cst_50 = arith.constant dense<0.000000e+00> : vector<16x128xf32>
    %105 = tpu.matmul %104, %102, %cst_50 {dimension_numbers = #tpu.dot_dimension_numbers<[1], [0], [0], [1], [0, 0, 1, 1], [], []>} : vector<16x64xf32>, vector<64x128xf32>, vector<16x128xf32> -> vector<16x128xf32>
    %c2_51 = arith.constant 2 : index
    %c0_52 = arith.constant 0 : index
    %c0_53 = arith.constant 0 : index
    %106 = vector.load %arg5[%c2_51, %c0_52, %c0_53] : memref<4x16x1xf32, #tpu.memory_space<vmem>>, vector<1x16x1xf32>
    %107 = vector.shape_cast %106 : vector<1x16x1xf32> to vector<16x1xf32>
    %108 = vector.broadcast %107 : vector<16x1xf32> to vector<16x128xf32>
    %109 = arith.addf %105, %108 : vector<16x128xf32>
    %110 = vector.extract_strided_slice %109 {offsets = [0, 0], sizes = [8, 128], strides = [1, 1]} : vector<16x128xf32> to vector<8x128xf32>
    %111 = vector.broadcast %20 : vector<8x1xf32> to vector<8x128xf32>
    %112 = arith.mulf %110, %111 : vector<8x128xf32>
    %113 = vector.extract_strided_slice %109 {offsets = [8, 0], sizes = [8, 128], strides = [1, 1]} : vector<16x128xf32> to vector<8x128xf32>
    %114 = vector.broadcast %20 : vector<8x1xf32> to vector<8x128xf32>
    %115 = arith.mulf %113, %114 : vector<8x128xf32>
    %116 = arith.subf %87, %115 : vector<8x128xf32>
    %117 = vector.broadcast %20 : vector<8x1xf32> to vector<8x128xf32>
    %118 = arith.mulf %117, %116 : vector<8x128xf32>
    %cst_54 = arith.constant 0.000000e+00 : f32
    %119 = vector.broadcast %cst_54 : f32 to vector<8x128xf32>
    %120 = arith.subf %119, %112 : vector<8x128xf32>
    %121 = math.exp %120 : vector<8x128xf32>
    %122 = arith.mulf %118, %121 : vector<8x128xf32>
    %123 = arith.addf %94, %122 : vector<8x128xf32>
    %cst_55 = arith.constant dense<0.000000e+00> : vector<128xf32>
    %124 = vector.multi_reduction <add>, %112, %cst_55 [0] : vector<8x128xf32> to vector<128xf32>
    %125 = vector.shape_cast %124 : vector<128xf32> to vector<1x128xf32>
    %cst_56 = arith.constant 0.000000e+00 : f32
    %126 = vector.broadcast %cst_56 : f32 to vector<1x128xf32>
    %127 = arith.subf %126, %125 : vector<1x128xf32>
    %c2_57 = arith.constant 2 : index
    %c0_58 = arith.constant 0 : index
    %128 = vector.load %arg7[%c2_57, %c0_58] : memref<4x128xf32, #tpu.memory_space<vmem>>, vector<1x128xf32>
    tpu.vector_store %arg7[%c2_57, %c0_58], %127 {strides = array<i32>} : memref<4x128xf32, #tpu.memory_space<vmem>>, vector<1x128xf32>,
    %129 = vector.broadcast %20 : vector<8x1xf32> to vector<8x128xf32>
    %130 = arith.mulf %123, %129 : vector<8x128xf32>
    %c3 = arith.constant 3 : index
    %c0_59 = arith.constant 0 : index
    %c0_60 = arith.constant 0 : index
    %131 = vector.load %arg2[%c3, %c0_59, %c0_60] : memref<4x64x8xf32, #tpu.memory_space<vmem>>, vector<1x64x8xf32>
    %132 = vector.shape_cast %131 : vector<1x64x8xf32> to vector<64x8xf32>
    %cst_61 = arith.constant dense<0.000000e+00> : vector<64x128xf32>
    %133 = tpu.matmul %132, %130, %cst_61 {dimension_numbers = #tpu.dot_dimension_numbers<[1], [0], [0], [1], [0, 0, 1, 1], [], []>} : vector<64x8xf32>, vector<8x128xf32>, vector<64x128xf32> -> vector<64x128xf32>
    %c3_62 = arith.constant 3 : index
    %c0_63 = arith.constant 0 : index
    %c0_64 = arith.constant 0 : index
    %134 = vector.load %arg3[%c3_62, %c0_63, %c0_64] : memref<4x64x1xf32, #tpu.memory_space<vmem>>, vector<1x64x1xf32>
    %135 = vector.shape_cast %134 : vector<1x64x1xf32> to vector<64x1xf32>
    %136 = vector.broadcast %135 : vector<64x1xf32> to vector<64x128xf32>
    %137 = arith.addf %133, %136 : vector<64x128xf32>
    %138 = math.tanh %137 : vector<64x128xf32>
    %c3_65 = arith.constant 3 : index
    %c0_66 = arith.constant 0 : index
    %c0_67 = arith.constant 0 : index
    %139 = vector.load %arg4[%c3_65, %c0_66, %c0_67] : memref<4x16x64xf32, #tpu.memory_space<vmem>>, vector<1x16x64xf32>
    %140 = vector.shape_cast %139 : vector<1x16x64xf32> to vector<16x64xf32>
    %cst_68 = arith.constant dense<0.000000e+00> : vector<16x128xf32>
    %141 = tpu.matmul %140, %138, %cst_68 {dimension_numbers = #tpu.dot_dimension_numbers<[1], [0], [0], [1], [0, 0, 1, 1], [], []>} : vector<16x64xf32>, vector<64x128xf32>, vector<16x128xf32> -> vector<16x128xf32>
    %c3_69 = arith.constant 3 : index
    %c0_70 = arith.constant 0 : index
    %c0_71 = arith.constant 0 : index
    %142 = vector.load %arg5[%c3_69, %c0_70, %c0_71] : memref<4x16x1xf32, #tpu.memory_space<vmem>>, vector<1x16x1xf32>
    %143 = vector.shape_cast %142 : vector<1x16x1xf32> to vector<16x1xf32>
    %144 = vector.broadcast %143 : vector<16x1xf32> to vector<16x128xf32>
    %145 = arith.addf %141, %144 : vector<16x128xf32>
    %146 = vector.extract_strided_slice %145 {offsets = [0, 0], sizes = [8, 128], strides = [1, 1]} : vector<16x128xf32> to vector<8x128xf32>
    %147 = vector.broadcast %18 : vector<8x1xf32> to vector<8x128xf32>
    %148 = arith.mulf %146, %147 : vector<8x128xf32>
    %149 = vector.extract_strided_slice %145 {offsets = [8, 0], sizes = [8, 128], strides = [1, 1]} : vector<16x128xf32> to vector<8x128xf32>
    %150 = vector.broadcast %18 : vector<8x1xf32> to vector<8x128xf32>
    %151 = arith.mulf %149, %150 : vector<8x128xf32>
    %152 = arith.subf %123, %151 : vector<8x128xf32>
    %153 = vector.broadcast %18 : vector<8x1xf32> to vector<8x128xf32>
    %154 = arith.mulf %153, %152 : vector<8x128xf32>
    %cst_72 = arith.constant 0.000000e+00 : f32
    %155 = vector.broadcast %cst_72 : f32 to vector<8x128xf32>
    %156 = arith.subf %155, %148 : vector<8x128xf32>
    %157 = math.exp %156 : vector<8x128xf32>
    %158 = arith.mulf %154, %157 : vector<8x128xf32>
    %159 = arith.addf %130, %158 : vector<8x128xf32>
    %cst_73 = arith.constant dense<0.000000e+00> : vector<128xf32>
    %160 = vector.multi_reduction <add>, %148, %cst_73 [0] : vector<8x128xf32> to vector<128xf32>
    %161 = vector.shape_cast %160 : vector<128xf32> to vector<1x128xf32>
    %cst_74 = arith.constant 0.000000e+00 : f32
    %162 = vector.broadcast %cst_74 : f32 to vector<1x128xf32>
    %163 = arith.subf %162, %161 : vector<1x128xf32>
    %c3_75 = arith.constant 3 : index
    %c0_76 = arith.constant 0 : index
    %164 = vector.load %arg7[%c3_75, %c0_76] : memref<4x128xf32, #tpu.memory_space<vmem>>, vector<1x128xf32>
    tpu.vector_store %arg7[%c3_75, %c0_76], %163 {strides = array<i32>} : memref<4x128xf32, #tpu.memory_space<vmem>>, vector<1x128xf32>,
    %c0_77 = arith.constant 0 : index
    %c0_78 = arith.constant 0 : index
    %165 = vector.load %arg6[%c0_77, %c0_78] : memref<8x128xf32, #tpu.memory_space<vmem>>, vector<8x128xf32>
    tpu.vector_store %arg6[%c0_77, %c0_78], %159 {strides = array<i32>} : memref<8x128xf32, #tpu.memory_space<vmem>>, vector<8x128xf32>,
    return
  }
  func.func @transform_0(%arg0: i32) -> (i32, i32) {
    %c0_i32 = arith.constant 0 : i32
    %c0_i32_0 = arith.constant 0 : i32
    return %c0_i32, %arg0 : i32, i32
  }
  func.func @transform_1(%arg0: i32) -> (i32, i32, i32) {
    %c0_i32 = arith.constant 0 : i32
    %c0_i32_0 = arith.constant 0 : i32
    %c0_i32_1 = arith.constant 0 : i32
    %c0_i32_2 = arith.constant 0 : i32
    return %c0_i32, %c0_i32_0, %c0_i32_1 : i32, i32, i32
  }
  func.func @transform_2(%arg0: i32) -> (i32, i32, i32) {
    %c0_i32 = arith.constant 0 : i32
    %c0_i32_0 = arith.constant 0 : i32
    %c0_i32_1 = arith.constant 0 : i32
    %c0_i32_2 = arith.constant 0 : i32
    return %c0_i32, %c0_i32_0, %c0_i32_1 : i32, i32, i32
  }
  func.func @transform_3(%arg0: i32) -> (i32, i32, i32) {
    %c0_i32 = arith.constant 0 : i32
    %c0_i32_0 = arith.constant 0 : i32
    %c0_i32_1 = arith.constant 0 : i32
    %c0_i32_2 = arith.constant 0 : i32
    return %c0_i32, %c0_i32_0, %c0_i32_1 : i32, i32, i32
  }
  func.func @transform_4(%arg0: i32) -> (i32, i32, i32) {
    %c0_i32 = arith.constant 0 : i32
    %c0_i32_0 = arith.constant 0 : i32
    %c0_i32_1 = arith.constant 0 : i32
    %c0_i32_2 = arith.constant 0 : i32
    return %c0_i32, %c0_i32_0, %c0_i32_1 : i32, i32, i32
  }
  func.func @transform_5(%arg0: i32) -> (i32, i32) {
    %c0_i32 = arith.constant 0 : i32
    %c0_i32_0 = arith.constant 0 : i32
    return %c0_i32, %arg0 : i32, i32
  }
  func.func @transform_6(%arg0: i32) -> (i32, i32) {
    %c0_i32 = arith.constant 0 : i32
    %c0_i32_0 = arith.constant 0 : i32
    return %c0_i32, %arg0 : i32, i32
  }
}

</mosaic_0001>

<bundles_post_ra>
// kernel: tpu_custom_call.1
= control target key start
LH: loop header
LB: loop body
LE: loop exit
PB: predicated region body
PF: predicated region fallthrough
CT: control target
= control target key end

     0   :  { %12 = vsyncpa [#allocation3], 0  ;;  %s2662_s0 = inlined_call_operand.vmem [shape: f32[8,256], index: 0, kind: input, shape index: {}]   ;;  %s2663_s1 = inlined_call_operand.vmem [shape: f32[4,64,8], index: 1, kind: input, shape index: {}]   ;;  %s2664_s2 = inlined_call_operand.vmem [shape: f32[4,64,1], index: 2, kind: input, shape index: {}]   ;;  %s2665_s3 = inlined_call_operand.vmem [shape: f32[4,16,64], index: 3, kind: input, shape index: {}]   ;;  %s2666_s4 = inlined_call_operand.vmem [shape: f32[4,16,1], index: 4, kind: input, shape index: {}]   ;;  %s2667_s5 = inlined_call_operand.hbm [shape: f32[8,256], index: 5, kind: output, shape index: {0}]   ;;  %s2668_s6 = inlined_call_operand.hbm [shape: f32[4,256], index: 6, kind: output, shape index: {1}]  }
   0x1   :  { %14 = vsyncpa [#allocation3 + $0x1], 0 }
   0x2   :  { %15 = vsyncpa [#allocation5], 0 }
   0x3   :  { %17 = vsyncpa [#allocation5 + $0x1], 0  ;;  %s2207_s21 = smov 0   ;;  %s2209_s22 = smov 0  }
   0x4   :  { %s2211_s23 = smov 0   ;;  %s2213_s24 = smov 0  }
   0x5 LB: > { %s2228_s25 = sadd.s32 4294967295, %s2167_s24   ;;  %s1637_s26 = sadd.s32 4294967294, %s2167_s24   ;;  %s2167_s24 = sphi %s2213_s24, %s2674_s24   ;;  %s2163_s23 = sphi %s2211_s23, %s2673_s23   ;;  %s2159_s22 = sphi %s2209_s22, %s2672_s22   ;;  %s2155_s21 = sphi %s2207_s21, %s2671_s21  }
   0x6   : > { %s2232_s27 = sadd.s32 1, %s2167_s24   ;;  %s140_s28 = sadd.s32 1, %s2163_s23 }
   0x7   : > { %s137_s29 = ssub.s32 %s2167_s24, %s2232_s27  ;;  %p150_p0 = scmp.ne.s32.totalorder %s2163_s23, %s2159_s22 }
   0x8   : > { %p138_p1 = scmp.eq.s32.totalorder %s137_s29, 0  ;;  %p151_p2 = scmp.eq.s32.totalorder %s2228_s25, 1 }
   0x9   : > { %p156_p3 = scmp.ne.s32.totalorder %s2159_s22, %s2155_s21  ;;  %p157_p4 = scmp.eq.s32.totalorder %s1637_s26, 1 }
   0xa   : > { %s2243_s30 = scalar_select %p138_p1, %s2163_s23, %s140_s28  }
   0xb   : > { %p2245_p5 = por %p151_p2, %p150_p0  ;;  %p2249_p6 = por %p157_p4, %p156_p3 }
   0xc   : > { %p1640_p7 = scmp.ge.s32.totalorder %s2167_s24, 1  ;;  %p220_p8 = scmp.lt.s32.totalorder %s2167_s24, 3 }
   0xe   : > { %p221_p9 = pnand %p1640_p7, %p220_p8 }
   0xf   : > { %p254_p10 = scmp.lt.s32.totalorder (!%p221_p9), %s2228_s25, 1  ;;  %s2439_s11 = sand.u32 (!%p221_p9), 1, %s2159_s22  }
  0x10   : > { %224 = sbr.rel (%p221_p9) target bundleno = 1906 (0x772), region = 40  ;;  %s1642_s12 = sshll.u32 (!%p221_p9), %s2439_s11, 2 }
  0x11   : > { %s1747_s20 = sshll.u32 (!%p221_p9), %s2228_s25, 6  ;;  %s1641_s28 = sshll.u32 (!%p221_p9), %s2439_s11, 3 }
  0x12   : > { %s1544_s10 = scalar_lea.hbm (!%p221_p9), %s2668_s6, %s1747_s20  ;;  %s2170_s15 = smov (!%p221_p9), [#allocation4]  }
  0x13   : > { %s2081_s16 = sshll.u32 (!%p221_p9), %s2170_s15, 4  ;;  %s2082_s16 = int_to_ptr.vmem [resolvable:$false] %s2081_s16 }
  0x14   : > { %s2083_s17 = scalar_lea.vmem (!%p221_p9), %s2082_s16, 128 }
  0x15   : > { %v259_v0 = vlaneseq  ;;  %v276_v1 = vld [vmem:[%s2663_s1] sm:$0xff]  ;;  %vm332_vm0 = vcmask 64512   ;;  %v291_v2 = vld [vmem:[%s2664_s2 + $0x38] sm:$0xff]  ;;  %v2169_v3 = vmov 0   ;;  %s255_s13 = scalar_select %p254_p10, %s2228_s25, 1  ;;  %v289_v5 = vld [vmem:[%s2664_s2 + $0x28] sm:$0xff] }
  0x16   : > { %1828 = vmatprep.mubr.msk.f32.mxu0 %vm332_vm0, %v276_v1  ;;  %2003 = vset.pattern.permute.xlu0 %v2169_v3  ;;  %v290_v6 = vld [vmem:[%s2664_s2 + $0x30] sm:$0xff]  ;;  %v288_v8 = vld [vmem:[%s2664_s2 + $0x20] sm:$0xff]  ;;  %v287_v11 = vld [vmem:[%s2664_s2 + $0x18] sm:$0xff]  ;;  %vm484_vm1 = vcmask 523264  }
  0x17   : > { %v260_v4 = vshrl.u32 %v259_v0, 7  ;;  %329 = vperm.xlu0 %2003, %v291_v2   ;;  %2004 = vset.pattern.permute.xlu1 %v2169_v3  ;;  %s1643_s18 = sshll.u32 %s255_s13, 3  ;;  %v286_v13 = vld [vmem:[%s2664_s2 + $0x10] sm:$0xff]  ;;  %v277_v14 = vld [vmem:[%s2663_s1 + $0x8] sm:$0xff]  ;;  %v284_v17 = vld [vmem:[%s2664_s2] sm:$0xff]  ;;  %s2444_s13 = scalar_lea.vmem [#allocation4], %s1642_s12 }
  0x18   : > { %319 = vperm.xlu1 %2004, %v289_v5   ;;  %s257_s29 = scalar_lea.vmem %s2662_s0, %s1643_s18  ;;  %v278_v15 = vld [vmem:[%s2663_s1 + $0x10] sm:$0xff]  ;;  %v285_v16 = vld [vmem:[%s2664_s2 + $0x8] sm:$0xff]  ;;  %v279_v18 = vld [vmem:[%s2663_s1 + $0x18] sm:$0xff]  ;;  %s1546_s26 = sshll.u32 %s2444_s13, 4  ;;  %s1547_s26 = int_to_ptr.vmem [resolvable:$true] %s1546_s26 }
  0x19   : > { %v265_v7 = vand.u32 1, %v260_v4  ;;  %v2276_v9 = vld [vmem:[%s257_s29] sm:$0xff]  ;;  %v473_v21 = vld [vmem:[%s2666_s4 + $0x8] sm:$0xff]  ;;  %v282_v23 = vld [vmem:[%s2663_s1 + $0x30] sm:$0xff]  ;;  %s1520_s12 = scalar_lea.sflag [#allocation5], %s2439_s11  ;;  %s2077_s14 = scalar_lea.vmem %s1547_s26, 64 }
  0x1a   : > { %v280_v19 = vld [vmem:[%s2663_s1 + $0x20] sm:$0xff]  ;;  %v281_v22 = vld [vmem:[%s2663_s1 + $0x28] sm:$0xff]  ;;  %v1669_v24 = vld [vmem:[%s2664_s2 + $0x78] sm:$0xff]  ;;  %p2078_p11 = scmp.ne.s32.totalorder %s1547_s26, %s2077_s14  ;;  %p2084_p0 = scmp.lt.s32.totalorder %s1547_s26, %s2082_s16 }
  0x1b   : > { %v2278_v10 = vcvt.s32.f32 %v265_v7  ;;  %324 = vperm.xlu0 %2003, %v290_v6   ;;  %v472_v20 = vld [vmem:[%s2666_s4] sm:$0xff]  ;;  %v1668_v25 = vld [vmem:[%s2664_s2 + $0x70] sm:$0xff]  ;;  %v283_v26 = vld [vmem:[%s2663_s1 + $0x38] sm:$0xff]  ;;  %p2085_p1 = scmp.lt.s32.totalorder %s2083_s17, %s2077_s14 }
  0x1c   : > { %314 = vperm.xlu1 %2004, %v288_v8   ;;  %v1667_v27 = vld [vmem:[%s2664_s2 + $0x68] sm:$0xff]  ;;  %v1666_v28 = vld [vmem:[%s2664_s2 + $0x60] sm:$0xff]  ;;  %v1665_v29 = vld [vmem:[%s2664_s2 + $0x58] sm:$0xff]  ;;  %p2079_p12 = pnand %p2078_p11, %p2245_p5 }
  0x1d   : > { %v2285_v12 = vmul.f32 %v2278_v10, %v2276_v9  ;;  %v1664_v30 = vld [vmem:[%s2664_s2 + $0x50] sm:$0xff]  ;;  %v1663_v31 = vld [vmem:[%s2664_s2 + $0x48] sm:$0xff]  ;;  %v1662_v32 = vld [vmem:[%s2664_s2 + $0x40] sm:$0xff]  ;;  %p2086_p2 = por %p2085_p1, %p2084_p0 }
  0x1e   : > { %v1680_v33 = vld [vmem:[%s2666_s4 + $0x10] sm:$0xff]  ;;  %v1681_v34 = vld [vmem:[%s2666_s4 + $0x18] sm:$0xff]  ;;  %v1697_v37 = vld [vmem:[%s2664_s2 + $0xa8] sm:$0xff]  ;;  %p2080_p13 = pneg %p2079_p12 }
  0x1f   : > { %1826 = vmatprep.subr.mxu0 %v2285_v12  ;;  %309 = vperm.xlu0 %2003, %v287_v11   ;;  %v1699_v35 = vld [vmem:[%s2664_s2 + $0xb8] sm:$0xff]  ;;  %v1698_v36 = vld [vmem:[%s2664_s2 + $0xb0] sm:$0xff]  ;;  %v1696_v38 = vld [vmem:[%s2664_s2 + $0xa0] sm:$0xff] }
  0x20   : > { %1827 = vmatpush3.msra.mxu0 %v2285_v12  ;;  %304 = vperm.xlu1 %2004, %v286_v13   ;;  %v1695_v39 = vld [vmem:[%s2664_s2 + $0x98] sm:$0xff]  ;;  %v1694_v40 = vld [vmem:[%s2664_s2 + $0x90] sm:$0xff]  ;;  %v1693_v41 = vld [vmem:[%s2664_s2 + $0x88] sm:$0xff]  ;;  %p2087_p3 = pnand %p2086_p2, %p2080_p13 }
  0x21   : > { %1829 = vmatmul.mubr.msk.f32.vlgmr.msra.gmra.mxu0 %vm332_vm0, %v277_v14  ;;  %v1692_v42 = vld [vmem:[%s2664_s2 + $0x80] sm:$0xff]  ;;  %v1711_v44 = vld [vmem:[%s2666_s4 + $0x28] sm:$0xff]  ;;  %v1729_v45 = vld [vmem:[%s2664_s2 + $0xf8] sm:$0xff] }
  0x22   : > { %1831 = vmatprep.mubr.msk.f32.mxu0 %vm332_vm0, %v278_v15  ;;  %v1710_v43 = vld [vmem:[%s2666_s4 + $0x20] sm:$0xff]  ;;  %v1728_v46 = vld [vmem:[%s2664_s2 + $0xf0] sm:$0xff]  ;;  %v1727_v47 = vld [vmem:[%s2664_s2 + $0xe8] sm:$0xff] }
  0x23   : > { %299 = vperm.xlu0 %2003, %v285_v16   ;;  %v1726_v48 = vld [vmem:[%s2664_s2 + $0xe0] sm:$0xff]  ;;  %v1725_v49 = vld [vmem:[%s2664_s2 + $0xd8] sm:$0xff]  ;;  %v1724_v50 = vld [vmem:[%s2664_s2 + $0xd0] sm:$0xff] }
  0x24   : > { %294 = vperm.xlu1 %2004, %v284_v17   ;;  %v1723_v51 = vld [vmem:[%s2664_s2 + $0xc8] sm:$0xff]  ;;  %v1722_v52 = vld [vmem:[%s2664_s2 + $0xc0] sm:$0xff]  ;;  %v1740_v53 = vld [vmem:[%s2666_s4 + $0x30] sm:$0xff] }
  0x25   : > { %1832 = vmatmul.mubr.msk.f32.gmra.mxu0 %vm332_vm0, %v279_v18  ;;  %v1741_v54 = vld [vmem:[%s2666_s4 + $0x38] sm:$0xff]  ;;  %v470_v55 = vld [vmem:[%s2665_s3] sm:$0xff] }
  0x26   : > { %1834 = vmatprep.mubr.msk.f32.mxu0 %vm332_vm0, %v280_v19  ;;  %1856 = vmatprep.mubr.msk.f32.mxu1 %vm484_vm1, %v470_v55  ;;  %v1659_v55 = vld [vmem:[%s2663_s1 + $0x68] sm:$0xff] }
  0x27   : > { %476 = vperm.xlu0 %2003, %v472_v20  }
  0x28   : > { %481 = vperm.xlu1 %2004, %v473_v21  }
  0x29   : > { %1835 = vmatmul.mubr.msk.f32.gmra.mxu0 %vm332_vm0, %v281_v22 }
  0x2a   : > { %1837 = vmatprep.mubr.msk.f32.mxu0 %vm332_vm0, %v282_v23 }
  0x2b   : > { %639 = vperm.xlu0 %2003, %v1669_v24  }
  0x2c   : > { %634 = vperm.xlu1 %2004, %v1668_v25  }
  0x2d   : > { %1838 = vmatmul.mubr.msk.f32.gmra.mxu0 %vm332_vm0, %v283_v26 }
  0x2f   : > { %629 = vperm.xlu0 %2003, %v1667_v27   ;;  %v471_v27 = vld [vmem:[%s2665_s3 + $0x8] sm:$0xff] }
  0x30   : > { %624 = vperm.xlu1 %2004, %v1666_v28   ;;  %v1654_v28 = vld [vmem:[%s2663_s1 + $0x40] sm:$0xff] }
  0x31   : > { %1861 = vmatprep.mubr.msk.f32.mxu0 %vm332_vm0, %v1654_v28 }
  0x33   : > { %619 = vperm.xlu0 %2003, %v1665_v29  }
  0x34   : > { %614 = vperm.xlu1 %2004, %v1664_v30  }
  0x37   : > { %609 = vperm.xlu0 %2003, %v1663_v31  }
  0x38   : > { %604 = vperm.xlu1 %2004, %v1662_v32   ;;  %v2435_v32 = vsub.f32 1.0, %v2278_v10 }
  0x3b   : > { %787 = vperm.xlu0 %2003, %v1680_v33  }
  0x3c   : > { %792 = vperm.xlu1 %2004, %v1681_v34  }
  0x3f   : > { %949 = vperm.xlu0 %2003, %v1699_v35  }
  0x40   : > { %944 = vperm.xlu1 %2004, %v1698_v36  }
  0x43   : > { %939 = vperm.xlu0 %2003, %v1697_v37  }
  0x44   : > { %934 = vperm.xlu1 %2004, %v1696_v38  }
  0x47   : > { %929 = vperm.xlu0 %2003, %v1695_v39  }
  0x48   : > { %924 = vperm.xlu1 %2004, %v1694_v40  }
  0x4b   : > { %919 = vperm.xlu0 %2003, %v1693_v41  }
  0x4c   : > { %914 = vperm.xlu1 %2004, %v1692_v42  }
  0x4f   : > { %1097 = vperm.xlu0 %2003, %v1710_v43  }
  0x50   : > { %1102 = vperm.xlu1 %2004, %v1711_v44  }
  0x53   : > { %1259 = vperm.xlu0 %2003, %v1729_v45  }
  0x54   : > { %1254 = vperm.xlu1 %2004, %v1728_v46  }
  0x57   : > { %1249 = vperm.xlu0 %2003, %v1727_v47  }
  0x58   : > { %1244 = vperm.xlu1 %2004, %v1726_v48  }
  0x5b   : > { %1239 = vperm.xlu0 %2003, %v1725_v49  }
  0x5c   : > { %1234 = vperm.xlu1 %2004, %v1724_v50  }
  0x5f   : > { %1229 = vperm.xlu0 %2003, %v1723_v51  }
  0x60   : > { %1224 = vperm.xlu1 %2004, %v1722_v52  }
  0x63   : > { %1407 = vperm.xlu0 %2003, %v1740_v53   ;;  %v1656_v53 = vld [vmem:[%s2663_s1 + $0x50] sm:$0xff] }
  0x64   : > { %1412 = vperm.xlu1 %2004, %v1741_v54   ;;  %v1658_v54 = vld [vmem:[%s2663_s1 + $0x60] sm:$0xff] }
  0x92   : > { %v330_v58 = vpop.permute.xlu0 %329 }
  0x93   : > { %v320_v60 = vpop.permute.xlu1 %319 }
  0x96   : > { %v325_v63 = vpop.permute.xlu0 %324 }
  0x97   : > { %v315_v1 = vpop.permute.xlu1 %314 }
  0x9a   : > { %v310_v7 = vpop.permute.xlu0 %309 }
  0x9b   : > { %v305_v11 = vpop.permute.xlu1 %304 }
  0x9e   : > { %v300_v15 = vpop.permute.xlu0 %299 }
  0x9f   : > { %v295_v17 = vpop.permute.xlu1 %294 }
  0xa2   : > { %v477_v30 = vpop.permute.xlu0 %476 }
  0xa3   : > { %v482_v39 = vpop.permute.xlu1 %481 }
  0xe1   : > { %v1830_v56 = vpop.f32.mrf.mxu0 }
  0xe2   : > { %v429_v16 = vadd.f32 %v1830_v56, %v300_v15  ;;  %v1660_v56 = vld [vmem:[%s2663_s1 + $0x70] sm:$0xff] }
  0xe3   : > { %v423_v57 = vpop.f32.mrf.mxu0 }
  0xe4   : > { %v424_v18 = vadd.f32 %v423_v57, %v295_v17  ;;  %v1661_v57 = vld [vmem:[%s2663_s1 + $0x78] sm:$0xff] }
  0xe5   : > { %v1833_v59 = vpop.f32.mrf.mxu0 }
  0xe6   : > { %v439_v13 = vadd.f32 %v1833_v59, %v310_v7 }
  0xe7   : > { %v433_v61 = vpop.f32.mrf.mxu0 }
  0xe8   : > { %v434_v14 = vadd.f32 %v433_v61, %v305_v11  ;;  %v640_v61 = vpop.permute.xlu0 %639 }
  0xe9   : > { %v1836_v62 = vpop.f32.mrf.mxu0 }
  0xea   : > { %v449_v5 = vadd.f32 %v1836_v62, %v320_v60 }
  0xeb   : > { %v443_v0 = vpop.f32.mrf.mxu0 }
  0xec   : > { %v444_v8 = vadd.f32 %v443_v0, %v315_v1 }
  0xed   : > { %v1839_v2 = vpop.f32.mrf.mxu0 }
  0xee   : > { %v459_v3 = vadd.f32 %v1839_v2, %v330_v58  ;;  %v1678_v58 = vld [vmem:[%s2665_s3 + $0x10] sm:$0xff]  ;;  %v630_v2 = vpop.permute.xlu0 %629 }
  0xef   : > { %v453_v4 = vpop.f32.mrf.mxu0 }
  0xf0   : > { %2005 = vtanh.f32 %v459_v3  ;;  %v454_v6 = vadd.f32 %v453_v4, %v325_v63  ;;  %v635_v63 = vpop.permute.xlu1 %634 }
  0xf2   : > { %2007 = vtanh.f32 %v454_v6 }
  0xf3   : > { %2009 = vtanh.f32 %v449_v5 }
  0xf4   : > { %2011 = vtanh.f32 %v444_v8  ;;  %v625_v4 = vpop.permute.xlu1 %624 }
  0xf5   : > { %2013 = vtanh.f32 %v439_v13  ;;  %v620_v13 = vpop.permute.xlu0 %619 }
  0xf6   : > { %2015 = vtanh.f32 %v434_v14 }
  0xf7   : > { %2017 = vtanh.f32 %v429_v16 }
  0xf8   : > { %2019 = vtanh.f32 %v424_v18  ;;  %v615_v15 = vpop.permute.xlu1 %614 }
  0xf9   : > { %v610_v18 = vpop.permute.xlu0 %609 }
  0xfd   : > { %v2006_v19 = vpop.eup %2005 }
  0xfe   : > { %1840 = vmatprep.subr.mxu1 %v2006_v19 }
  0xff   : > { %v2008_v20 = vpop.eup %2007  ;;  %1841 = vmatpush3.msra.mxu1 %v2006_v19 }
 0x100   : > { %1842 = vmatprep.subr.mxu1 %v2008_v20  ;;  %v2010_v21 = vpop.eup %2009 }
 0x101   : > { %1843 = vmatpush3.msra.mxu1 %v2008_v20  ;;  %v2012_v22 = vpop.eup %2011  ;;  %v605_v20 = vpop.permute.xlu1 %604 }
 0x102   : > { %1844 = vmatprep.subr.mxu1 %v2010_v21  ;;  %v2014_v23 = vpop.eup %2013 }
 0x103   : > { %1845 = vmatpush3.msra.mxu1 %v2010_v21  ;;  %v2016_v24 = vpop.eup %2015 }
 0x104   : > { %1846 = vmatprep.subr.mxu1 %v2012_v22  ;;  %v2018_v25 = vpop.eup %2017 }
 0x105   : > { %1847 = vmatpush3.msra.mxu1 %v2012_v22  ;;  %v2020_v26 = vpop.eup %2019 }
 0x106   : > { %1848 = vmatprep.subr.mxu1 %v2014_v23 }
 0x107   : > { %1849 = vmatpush3.msra.mxu1 %v2014_v23 }
 0x108   : > { %1850 = vmatprep.subr.mxu1 %v2016_v24 }
 0x109   : > { %1851 = vmatpush3.msra.mxu1 %v2016_v24 }
 0x10a   : > { %1852 = vmatprep.subr.mxu1 %v2018_v25 }
 0x10b   : > { %1853 = vmatpush3.msra.mxu1 %v2018_v25 }
 0x10c   : > { %1854 = vmatprep.subr.mxu1 %v2020_v26 }
 0x10d   : > { %1855 = vmatpush3.msra.mxu1 %v2020_v26 }
 0x10e   : > { %1857 = vmatmul.mubr.msk.f32.vlgmr.msra.gmra.mxu1 %vm484_vm1, %v471_v27 }
 0x10f   : > { %1889 = vmatprep.mubr.msk.f32.mxu1 %vm484_vm1, %v1678_v58  ;;  %v1689_v58 = vld [vmem:[%s2663_s1 + $0xa8] sm:$0xff] }
 0x1ce   : > { %v1858_v29 = vpop.f32.mrf.mxu1 }
 0x1cf   : > { %v563_v40 = vadd.f32 %v1858_v29, %v482_v39 }
 0x1d0   : > { %v557_v31 = vpop.f32.mrf.mxu1 }
 0x1d1   : > { %v558_v33 = vadd.f32 %v557_v31, %v477_v30  ;;  %v567_v43 = vmul.f32 %v563_v40, %v2435_v32  ;;  %v1679_v30 = vld [vmem:[%s2665_s3 + $0x18] sm:$0xff]  ;;  %v1684_v31 = vld [vmem:[%s2663_s1 + $0x80] sm:$0xff] }
 0x1d3   : > { %v566_v34 = vmul.f32 %v558_v33, %v2435_v32  ;;  %v568_v46 = vsub.f32 %v2276_v9, %v567_v43  ;;  %v1655_v9 = vld [vmem:[%s2663_s1 + $0x48] sm:$0xff] }
 0x1d5   : > { %v570_v35 = vsub.f32 0.0, %v566_v34  ;;  %v575_v36 = vrot.slane %v566_v34, 4  ;;  %v569_v48 = vmul.f32 %v568_v46, %v2435_v32 }
 0x1d7   : > { %v571_v37 = vmul.f32 1.442695, %v570_v35  ;;  %v576_v38 = vadd.f32 %v575_v36, %v566_v34  ;;  %v788_v34 = vpop.permute.xlu0 %787 }
 0x1d9   : > { %2021 = vpow2.f32 %v571_v37  ;;  %v577_v41 = vrot.slane %v576_v38, 2 }
 0x1db   : > { %v578_v42 = vadd.f32 %v577_v41, %v576_v38 }
 0x1dd   : > { %v579_v44 = vrot.slane %v578_v42, 1 }
 0x1df   : > { %v580_v45 = vadd.f32 %v579_v44, %v578_v42  ;;  %v793_v42 = vpop.permute.xlu1 %792 }
 0x1e1   : > { %v581_v47 = vsub.f32 0.0, %v580_v45 }
 0x1e3   : > { %582 = vst [vmem:[%s2444_s13] sm:$0x1] %v581_v47 }
 0x1e6   : > { %v2022_v49 = vpop.eup %2021 }
 0x1e7   : > { %v573_v50 = vmul.f32 %v2022_v49, %v569_v48 }
 0x1e9   : > { %v2449_v51 = vadd.f32 %v573_v50, %v2285_v12  ;;  %v1657_v12 = vld [vmem:[%s2663_s1 + $0x58] sm:$0xff] }
 0x1eb   : > { %v2453_v52 = vmul.f32 %v2449_v51, %v2435_v32 }
 0x1ed   : > { %1859 = vmatprep.subr.mxu0 %v2453_v52 }
 0x1ee   : > { %1860 = vmatpush3.msra.mxu0 %v2453_v52 }
 0x1ef   : > { %1862 = vmatmul.mubr.msk.f32.vlgmr.msra.gmra.mxu0 %vm332_vm0, %v1655_v9 }
 0x1f0   : > { %1864 = vmatprep.mubr.msk.f32.mxu0 %vm332_vm0, %v1656_v53 }
 0x1f3   : > { %1865 = vmatmul.mubr.msk.f32.gmra.mxu0 %vm332_vm0, %v1657_v12 }
 0x1f4   : > { %1867 = vmatprep.mubr.msk.f32.mxu0 %vm332_vm0, %v1658_v54 }
 0x1f7   : > { %1868 = vmatmul.mubr.msk.f32.gmra.mxu0 %vm332_vm0, %v1659_v55 }
 0x1f8   : > { %1870 = vmatprep.mubr.msk.f32.mxu0 %vm332_vm0, %v1660_v56  ;;  %v1685_v56 = vld [vmem:[%s2663_s1 + $0x88] sm:$0xff] }
 0x1fb   : > { %1871 = vmatmul.mubr.msk.f32.gmra.mxu0 %vm332_vm0, %v1661_v57  ;;  %v1688_v57 = vld [vmem:[%s2663_s1 + $0xa0] sm:$0xff] }
 0x1fc   : > { %1894 = vmatprep.mubr.msk.f32.mxu0 %vm332_vm0, %v1684_v31 }
 0x2af   : > { %v1863_v59 = vpop.f32.mrf.mxu0 }
 0x2b0   : > { %v738_v19 = vadd.f32 %v1863_v59, %v610_v18  ;;  %v1690_v59 = vld [vmem:[%s2663_s1 + $0xb0] sm:$0xff] }
 0x2b1   : > { %v732_v60 = vpop.f32.mrf.mxu0 }
 0x2b2   : > { %v733_v21 = vadd.f32 %v732_v60, %v605_v20  ;;  %v1691_v60 = vld [vmem:[%s2663_s1 + $0xb8] sm:$0xff] }
 0x2b3   : > { %v1866_v62 = vpop.f32.mrf.mxu0 }
 0x2b4   : > { %v748_v16 = vadd.f32 %v1866_v62, %v620_v13 }
 0x2b5   : > { %v742_v0 = vpop.f32.mrf.mxu0 }
 0x2b6   : > { %v743_v17 = vadd.f32 %v742_v0, %v615_v15  ;;  %v950_v0 = vpop.permute.xlu0 %949 }
 0x2b7   : > { %v1869_v1 = vpop.f32.mrf.mxu0 }
 0x2b8   : > { %v758_v8 = vadd.f32 %v1869_v1, %v630_v2  ;;  %v945_v2 = vpop.permute.xlu1 %944 }
 0x2b9   : > { %v752_v3 = vpop.f32.mrf.mxu0 }
 0x2ba   : > { %v753_v14 = vadd.f32 %v752_v3, %v625_v4 }
 0x2bb   : > { %v1872_v5 = vpop.f32.mrf.mxu0 }
 0x2bc   : > { %v768_v6 = vadd.f32 %v1872_v5, %v640_v61  ;;  %v1708_v61 = vld [vmem:[%s2665_s3 + $0x20] sm:$0xff]  ;;  %v940_v5 = vpop.permute.xlu0 %939 }
 0x2bd   : > { %v762_v7 = vpop.f32.mrf.mxu0 }
 0x2be   : > { %2023 = vtanh.f32 %v768_v6  ;;  %v763_v11 = vadd.f32 %v762_v7, %v635_v63  ;;  %v935_v7 = vpop.permute.xlu1 %934 }
 0x2c0   : > { %2025 = vtanh.f32 %v763_v11 }
 0x2c1   : > { %2027 = vtanh.f32 %v758_v8 }
 0x2c2   : > { %2029 = vtanh.f32 %v753_v14  ;;  %v925_v18 = vpop.permute.xlu1 %924 }
 0x2c3   : > { %2031 = vtanh.f32 %v748_v16  ;;  %v930_v16 = vpop.permute.xlu0 %929 }
 0x2c4   : > { %2033 = vtanh.f32 %v743_v17 }
 0x2c5   : > { %2035 = vtanh.f32 %v738_v19 }
 0x2c6   : > { %2037 = vtanh.f32 %v733_v21 }
 0x2c7   : > { %v920_v21 = vpop.permute.xlu0 %919 }
 0x2cb   : > { %v2024_v22 = vpop.eup %2023 }
 0x2cc   : > { %1873 = vmatprep.subr.mxu1 %v2024_v22 }
 0x2cd   : > { %v2026_v23 = vpop.eup %2025  ;;  %1874 = vmatpush3.msra.mxu1 %v2024_v22 }
 0x2ce   : > { %1875 = vmatprep.subr.mxu1 %v2026_v23  ;;  %v2028_v24 = vpop.eup %2027 }
 0x2cf   : > { %1876 = vmatpush3.msra.mxu1 %v2026_v23  ;;  %v2030_v25 = vpop.eup %2029  ;;  %v915_v23 = vpop.permute.xlu1 %914 }
 0x2d0   : > { %1877 = vmatprep.subr.mxu1 %v2028_v24  ;;  %v2032_v26 = vpop.eup %2031 }
 0x2d1   : > { %1878 = vmatpush3.msra.mxu1 %v2028_v24  ;;  %v2034_v27 = vpop.eup %2033 }
 0x2d2   : > { %1879 = vmatprep.subr.mxu1 %v2030_v25  ;;  %v2036_v28 = vpop.eup %2035 }
 0x2d3   : > { %1880 = vmatpush3.msra.mxu1 %v2030_v25  ;;  %v2038_v29 = vpop.eup %2037 }
 0x2d4   : > { %1881 = vmatprep.subr.mxu1 %v2032_v26 }
 0x2d5   : > { %1882 = vmatpush3.msra.mxu1 %v2032_v26 }
 0x2d6   : > { %1883 = vmatprep.subr.mxu1 %v2034_v27 }
 0x2d7   : > { %1884 = vmatpush3.msra.mxu1 %v2034_v27 }
 0x2d8   : > { %1885 = vmatprep.subr.mxu1 %v2036_v28 }
 0x2d9   : > { %1886 = vmatpush3.msra.mxu1 %v2036_v28 }
 0x2da   : > { %1887 = vmatprep.subr.mxu1 %v2038_v29 }
 0x2db   : > { %1888 = vmatpush3.msra.mxu1 %v2038_v29 }
 0x2dc   : > { %1890 = vmatmul.mubr.msk.f32.vlgmr.msra.gmra.mxu1 %vm484_vm1, %v1679_v30 }
 0x2dd   : > { %1922 = vmatprep.mubr.msk.f32.mxu1 %vm484_vm1, %v1708_v61  ;;  %v1720_v61 = vld [vmem:[%s2663_s1 + $0xf0] sm:$0xff] }
 0x39c   : > { %v1891_v33 = vpop.f32.mrf.mxu1 }
 0x39d   : > { %v873_v43 = vadd.f32 %v1891_v33, %v793_v42 }
 0x39e   : > { %v867_v35 = vpop.f32.mrf.mxu1 }
 0x39f   : > { %v868_v36 = vadd.f32 %v867_v35, %v788_v34  ;;  %v877_v46 = vmul.f32 %v873_v43, %v2278_v10  ;;  %v1709_v34 = vld [vmem:[%s2665_s3 + $0x28] sm:$0xff]  ;;  %v1714_v35 = vld [vmem:[%s2663_s1 + $0xc0] sm:$0xff] }
 0x3a1   : > { %v876_v37 = vmul.f32 %v868_v36, %v2278_v10  ;;  %v878_v49 = vsub.f32 %v2449_v51, %v877_v46  ;;  %v1686_v51 = vld [vmem:[%s2663_s1 + $0x90] sm:$0xff] }
 0x3a3   : > { %v880_v38 = vsub.f32 0.0, %v876_v37  ;;  %v885_v39 = vrot.slane %v876_v37, 4  ;;  %v879_v9 = vmul.f32 %v878_v49, %v2278_v10 }
 0x3a5   : > { %v881_v40 = vmul.f32 1.442695, %v880_v38  ;;  %v886_v41 = vadd.f32 %v885_v39, %v876_v37  ;;  %v1098_v37 = vpop.permute.xlu0 %1097 }
 0x3a7   : > { %2039 = vpow2.f32 %v881_v40  ;;  %v887_v44 = vrot.slane %v886_v41, 2 }
 0x3a9   : > { %v888_v45 = vadd.f32 %v887_v44, %v886_v41 }
 0x3ab   : > { %v889_v47 = vrot.slane %v888_v45, 1 }
 0x3ad   : > { %v890_v48 = vadd.f32 %v889_v47, %v888_v45  ;;  %v1103_v45 = vpop.permute.xlu1 %1102 }
 0x3af   : > { %v891_v50 = vsub.f32 0.0, %v890_v48 }
 0x3b1   : > { %892 = vst [vmem:[%s2444_s13 + $0x1] sm:$0x1] %v891_v50 }
 0x3b4   : > { %v2040_v53 = vpop.eup %2039 }
 0x3b5   : > { %v883_v12 = vmul.f32 %v2040_v53, %v879_v9 }
 0x3b7   : > { %v2503_v54 = vadd.f32 %v883_v12, %v2453_v52  ;;  %v1687_v52 = vld [vmem:[%s2663_s1 + $0x98] sm:$0xff] }
 0x3b9   : > { %v2507_v55 = vmul.f32 %v2503_v54, %v2278_v10 }
 0x3bb   : > { %1892 = vmatprep.subr.mxu0 %v2507_v55 }
 0x3bc   : > { %1893 = vmatpush3.msra.mxu0 %v2507_v55 }
 0x3bd   : > { %1895 = vmatmul.mubr.msk.f32.vlgmr.msra.gmra.mxu0 %vm332_vm0, %v1685_v56 }
 0x3be   : > { %1897 = vmatprep.mubr.msk.f32.mxu0 %vm332_vm0, %v1686_v51 }
 0x3c1   : > { %1898 = vmatmul.mubr.msk.f32.gmra.mxu0 %vm332_vm0, %v1687_v52 }
 0x3c2   : > { %1900 = vmatprep.mubr.msk.f32.mxu0 %vm332_vm0, %v1688_v57 }
 0x3c5   : > { %1901 = vmatmul.mubr.msk.f32.gmra.mxu0 %vm332_vm0, %v1689_v58 }
 0x3c6   : > { %1903 = vmatprep.mubr.msk.f32.mxu0 %vm332_vm0, %v1690_v59  ;;  %v1715_v59 = vld [vmem:[%s2663_s1 + $0xc8] sm:$0xff] }
 0x3c9   : > { %1904 = vmatmul.mubr.msk.f32.gmra.mxu0 %vm332_vm0, %v1691_v60  ;;  %v1719_v60 = vld [vmem:[%s2663_s1 + $0xe8] sm:$0xff] }
 0x3ca   : > { %1927 = vmatprep.mubr.msk.f32.mxu0 %vm332_vm0, %v1714_v35 }
 0x47d   : > { %v1896_v62 = vpop.f32.mrf.mxu0 }
 0x47e   : > { %v1048_v22 = vadd.f32 %v1896_v62, %v920_v21  ;;  %v1721_v62 = vld [vmem:[%s2663_s1 + $0xf8] sm:$0xff] }
 0x47f   : > { %v1042_v63 = vpop.f32.mrf.mxu0 }
 0x480   : > { %v1043_v24 = vadd.f32 %v1042_v63, %v915_v23  ;;  %v1738_v63 = vld [vmem:[%s2665_s3 + $0x30] sm:$0xff] }
 0x481   : > { %v1899_v1 = vpop.f32.mrf.mxu0 }
 0x482   : > { %v1058_v19 = vadd.f32 %v1899_v1, %v930_v16 }
 0x483   : > { %v1052_v3 = vpop.f32.mrf.mxu0 }
 0x484   : > { %v1053_v20 = vadd.f32 %v1052_v3, %v925_v18 }
 0x485   : > { %v1902_v4 = vpop.f32.mrf.mxu0 }
 0x486   : > { %v1068_v14 = vadd.f32 %v1902_v4, %v940_v5  ;;  %v1255_v4 = vpop.permute.xlu1 %1254 }
 0x487   : > { %v1062_v6 = vpop.f32.mrf.mxu0 }
 0x488   : > { %v1063_v17 = vadd.f32 %v1062_v6, %v935_v7 }
 0x489   : > { %v1905_v8 = vpop.f32.mrf.mxu0 }
 0x48a   : > { %v1078_v11 = vadd.f32 %v1905_v8, %v950_v0 }
 0x48b   : > { %v1072_v13 = vpop.f32.mrf.mxu0 }
 0x48c   : > { %2041 = vtanh.f32 %v1078_v11  ;;  %v1073_v15 = vadd.f32 %v1072_v13, %v945_v2  ;;  %v1260_v2 = vpop.permute.xlu0 %1259  ;;  %v1245_v11 = vpop.permute.xlu1 %1244 }
 0x48e   : > { %2043 = vtanh.f32 %v1073_v15 }
 0x48f   : > { %2045 = vtanh.f32 %v1068_v14 }
 0x490   : > { %2047 = vtanh.f32 %v1063_v17  ;;  %v1250_v7 = vpop.permute.xlu0 %1249 }
 0x491   : > { %2049 = vtanh.f32 %v1058_v19 }
 0x492   : > { %2051 = vtanh.f32 %v1053_v20  ;;  %v1235_v20 = vpop.permute.xlu1 %1234 }
 0x493   : > { %2053 = vtanh.f32 %v1048_v22 }
 0x494   : > { %2055 = vtanh.f32 %v1043_v24  ;;  %v1240_v18 = vpop.permute.xlu0 %1239 }
 0x498   : > { %v1230_v23 = vpop.permute.xlu0 %1229 }
 0x499   : > { %v2042_v25 = vpop.eup %2041 }
 0x49a   : > { %1906 = vmatprep.subr.mxu1 %v2042_v25 }
 0x49b   : > { %v2044_v26 = vpop.eup %2043  ;;  %1907 = vmatpush3.msra.mxu1 %v2042_v25  ;;  %v1225_v25 = vpop.permute.xlu1 %1224 }
 0x49c   : > { %1908 = vmatprep.subr.mxu1 %v2044_v26  ;;  %v2046_v27 = vpop.eup %2045 }
 0x49d   : > { %1909 = vmatpush3.msra.mxu1 %v2044_v26  ;;  %v2048_v28 = vpop.eup %2047 }
 0x49e   : > { %1910 = vmatprep.subr.mxu1 %v2046_v27  ;;  %v2050_v29 = vpop.eup %2049 }
 0x49f   : > { %1911 = vmatpush3.msra.mxu1 %v2046_v27  ;;  %v2052_v30 = vpop.eup %2051 }
 0x4a0   : > { %1912 = vmatprep.subr.mxu1 %v2048_v28  ;;  %v2054_v31 = vpop.eup %2053 }
 0x4a1   : > { %1913 = vmatpush3.msra.mxu1 %v2048_v28  ;;  %v2056_v33 = vpop.eup %2055 }
 0x4a2   : > { %1914 = vmatprep.subr.mxu1 %v2050_v29 }
 0x4a3   : > { %1915 = vmatpush3.msra.mxu1 %v2050_v29 }
 0x4a4   : > { %1916 = vmatprep.subr.mxu1 %v2052_v30 }
 0x4a5   : > { %1917 = vmatpush3.msra.mxu1 %v2052_v30 }
 0x4a6   : > { %1918 = vmatprep.subr.mxu1 %v2054_v31 }
 0x4a7   : > { %1919 = vmatpush3.msra.mxu1 %v2054_v31 }
 0x4a8   : > { %1920 = vmatprep.subr.mxu1 %v2056_v33 }
 0x4a9   : > { %1921 = vmatpush3.msra.mxu1 %v2056_v33 }
 0x4aa   : > { %1923 = vmatmul.mubr.msk.f32.vlgmr.msra.gmra.mxu1 %vm484_vm1, %v1709_v34 }
 0x4ab   : > { %1955 = vmatprep.mubr.msk.f32.mxu1 %vm484_vm1, %v1738_v63 }
 0x56a   : > { %v1924_v36 = vpop.f32.mrf.mxu1 }
 0x56b   : > { %v1183_v46 = vadd.f32 %v1924_v36, %v1103_v45  ;;  %v1739_v36 = vld [vmem:[%s2665_s3 + $0x38] sm:$0xff] }
 0x56c   : > { %v1177_v38 = vpop.f32.mrf.mxu1 }
 0x56d   : > { %v1178_v39 = vadd.f32 %v1177_v38, %v1098_v37  ;;  %v1187_v49 = vmul.f32 %v1183_v46, %v2435_v32  ;;  %v1408_v38 = vpop.permute.xlu0 %1407  ;;  %v1413_v46 = vpop.permute.xlu1 %1412 }
 0x56f   : > { %v1186_v40 = vmul.f32 %v1178_v39, %v2435_v32  ;;  %v1188_v53 = vsub.f32 %v2503_v54, %v1187_v49  ;;  %v1716_v54 = vld [vmem:[%s2663_s1 + $0xd0] sm:$0xff] }
 0x571   : > { %v1190_v41 = vsub.f32 0.0, %v1186_v40  ;;  %v1195_v42 = vrot.slane %v1186_v40, 4  ;;  %v1189_v56 = vmul.f32 %v1188_v53, %v2435_v32 }
 0x573   : > { %v1191_v43 = vmul.f32 1.442695, %v1190_v41  ;;  %v1196_v44 = vadd.f32 %v1195_v42, %v1186_v40 }
 0x575   : > { %2057 = vpow2.f32 %v1191_v43  ;;  %v1197_v47 = vrot.slane %v1196_v44, 2 }
 0x577   : > { %v1198_v48 = vadd.f32 %v1197_v47, %v1196_v44 }
 0x579   : > { %v1199_v50 = vrot.slane %v1198_v48, 1 }
 0x57b   : > { %v1200_v9 = vadd.f32 %v1199_v50, %v1198_v48 }
 0x57d   : > { %v1201_v12 = vsub.f32 0.0, %v1200_v9 }
 0x57f   : > { %1202 = vst [vmem:[%s2444_s13 + $0x2] sm:$0x1] %v1201_v12 }
 0x582   : > { %v2058_v51 = vpop.eup %2057 }
 0x583   : > { %v1193_v52 = vmul.f32 %v2058_v51, %v1189_v56 }
 0x585   : > { %v2557_v57 = vadd.f32 %v1193_v52, %v2507_v55  ;;  %v1718_v55 = vld [vmem:[%s2663_s1 + $0xe0] sm:$0xff] }
 0x587   : > { %v2561_v58 = vmul.f32 %v2557_v57, %v2435_v32  ;;  %v1717_v32 = vld [vmem:[%s2663_s1 + $0xd8] sm:$0xff] }
 0x589   : > { %1925 = vmatprep.subr.mxu0 %v2561_v58 }
 0x58a   : > { %1926 = vmatpush3.msra.mxu0 %v2561_v58 }
 0x58b   : > { %1928 = vmatmul.mubr.msk.f32.vlgmr.msra.gmra.mxu0 %vm332_vm0, %v1715_v59 }
 0x58c   : > { %1930 = vmatprep.mubr.msk.f32.mxu0 %vm332_vm0, %v1716_v54 }
 0x58f   : > { %1931 = vmatmul.mubr.msk.f32.gmra.mxu0 %vm332_vm0, %v1717_v32 }
 0x590   : > { %1933 = vmatprep.mubr.msk.f32.mxu0 %vm332_vm0, %v1718_v55 }
 0x593   : > { %1934 = vmatmul.mubr.msk.f32.gmra.mxu0 %vm332_vm0, %v1719_v60 }
 0x594   : > { %1936 = vmatprep.mubr.msk.f32.mxu0 %vm332_vm0, %v1720_v61 }
 0x597   : > { %1937 = vmatmul.mubr.msk.f32.gmra.mxu0 %vm332_vm0, %v1721_v62 }
 0x64b   : > { %v1929_v0 = vpop.f32.mrf.mxu0 }
 0x64c   : > { %v1358_v24 = vadd.f32 %v1929_v0, %v1230_v23 }
 0x64d   : > { %v1352_v1 = vpop.f32.mrf.mxu0 }
 0x64e   : > { %v1353_v26 = vadd.f32 %v1352_v1, %v1225_v25 }
 0x64f   : > { %v1932_v3 = vpop.f32.mrf.mxu0 }
 0x650   : > { %v1368_v21 = vadd.f32 %v1932_v3, %v1240_v18 }
 0x651   : > { %v1362_v5 = vpop.f32.mrf.mxu0 }
 0x652   : > { %v1363_v22 = vadd.f32 %v1362_v5, %v1235_v20 }
 0x653   : > { %v1935_v6 = vpop.f32.mrf.mxu0 }
 0x654   : > { %v1378_v16 = vadd.f32 %v1935_v6, %v1250_v7 }
 0x655   : > { %v1372_v8 = vpop.f32.mrf.mxu0 }
 0x656   : > { %v1373_v19 = vadd.f32 %v1372_v8, %v1245_v11 }
 0x657   : > { %v1938_v13 = vpop.f32.mrf.mxu0 }
 0x658   : > { %v1388_v14 = vadd.f32 %v1938_v13, %v1260_v2 }
 0x659   : > { %v1382_v15 = vpop.f32.mrf.mxu0 }
 0x65a   : > { %2059 = vtanh.f32 %v1388_v14  ;;  %v1383_v17 = vadd.f32 %v1382_v15, %v1255_v4 }
 0x65c   : > { %2061 = vtanh.f32 %v1383_v17 }
 0x65d   : > { %2063 = vtanh.f32 %v1378_v16 }
 0x65e   : > { %2065 = vtanh.f32 %v1373_v19 }
 0x65f   : > { %2067 = vtanh.f32 %v1368_v21 }
 0x660   : > { %2069 = vtanh.f32 %v1363_v22 }
 0x661   : > { %2071 = vtanh.f32 %v1358_v24 }
 0x662   : > { %2073 = vtanh.f32 %v1353_v26 }
 0x667   : > { %v2060_v27 = vpop.eup %2059 }
 0x668   : > { %1939 = vmatprep.subr.mxu1 %v2060_v27 }
 0x669   : > { %v2062_v28 = vpop.eup %2061  ;;  %1940 = vmatpush3.msra.mxu1 %v2060_v27 }
 0x66a   : > { %1941 = vmatprep.subr.mxu1 %v2062_v28  ;;  %v2064_v29 = vpop.eup %2063 }
 0x66b   : > { %1942 = vmatpush3.msra.mxu1 %v2062_v28  ;;  %v2066_v30 = vpop.eup %2065 }
 0x66c   : > { %1943 = vmatprep.subr.mxu1 %v2064_v29  ;;  %v2068_v31 = vpop.eup %2067 }
 0x66d   : > { %1944 = vmatpush3.msra.mxu1 %v2064_v29  ;;  %v2070_v33 = vpop.eup %2069 }
 0x66e   : > { %1945 = vmatprep.subr.mxu1 %v2066_v30  ;;  %v2072_v34 = vpop.eup %2071 }
 0x66f   : > { %1946 = vmatpush3.msra.mxu1 %v2066_v30  ;;  %v2074_v35 = vpop.eup %2073 }
 0x670   : > { %1947 = vmatprep.subr.mxu1 %v2068_v31 }
 0x671   : > { %1948 = vmatpush3.msra.mxu1 %v2068_v31 }
 0x672   : > { %1949 = vmatprep.subr.mxu1 %v2070_v33 }
 0x673   : > { %1950 = vmatpush3.msra.mxu1 %v2070_v33 }
 0x674   : > { %1951 = vmatprep.subr.mxu1 %v2072_v34 }
 0x675   : > { %1952 = vmatpush3.msra.mxu1 %v2072_v34 }
 0x676   : > { %1953 = vmatprep.subr.mxu1 %v2074_v35 }
 0x677   : > { %1954 = vmatpush3.msra.mxu1 %v2074_v35 }
 0x678   : > { %1956 = vmatmul.mubr.msk.f32.vlgmr.msra.gmra.mxu1 %vm484_vm1, %v1739_v36 }
 0x738   : > { %v1957_v37 = vpop.f32.mrf.mxu1 }
 0x739   : > { %v1493_v47 = vadd.f32 %v1957_v37, %v1413_v46 }
 0x73a   : > { %v1487_v39 = vpop.f32.mrf.mxu1 }
 0x73b   : > { %v1488_v40 = vadd.f32 %v1487_v39, %v1408_v38  ;;  %v1497_v50 = vmul.f32 %v1493_v47, %v2278_v10 }
 0x73d   : > { %v1496_v41 = vmul.f32 %v1488_v40, %v2278_v10  ;;  %v1498_v12 = vsub.f32 %v2557_v57, %v1497_v50 }
 0x73f   : > { %v1500_v42 = vsub.f32 0.0, %v1496_v41  ;;  %v1505_v43 = vrot.slane %v1496_v41, 4 }
 0x741   : > { %v1501_v44 = vmul.f32 1.442695, %v1500_v42  ;;  %v1506_v45 = vadd.f32 %v1505_v43, %v1496_v41 }
 0x743   : > { %2075 = vpow2.f32 %v1501_v44  ;;  %v1507_v48 = vrot.slane %v1506_v45, 2 }
 0x745   : > { %v1508_v49 = vadd.f32 %v1507_v48, %v1506_v45 }
 0x747   : > { %v1509_v9 = vrot.slane %v1508_v49, 1 }
 0x749   : > { %v1510_v53 = vadd.f32 %v1509_v9, %v1508_v49 }
 0x74b   : > { %v1511_v56 = vsub.f32 0.0, %v1510_v53 }
 0x74d   : > { %1512 = vst [vmem:[%s2444_s13 + $0x3] sm:$0x1] %v1511_v56 }
 0x74e   : > { %2090 = shalt.err (!%p2087_p3)
}
 0x74f   : > { %s2091_s18 = scalar_lea.hbm %s1544_s10, 64  ;;  %s2095_s20 = scalar_lea.hbm %s2668_s6, 128 }
 0x750   : > { %p2092_p4 = scmp.ne.s32.totalorder %s1544_s10, %s2091_s18  ;;  %p2096_p9 = scmp.lt.s32.totalorder %s1544_s10, %s2668_s6 }
 0x751   : > { %p2097_p10 = scmp.lt.s32.totalorder %s2095_s20, %s2091_s18 }
 0x752   : > { %p2093_p7 = pnand %p2092_p4, %p2245_p5 }
 0x753   : > { %p2098_p11 = por %p2097_p10, %p2096_p9 }
 0x754   : > { %p2094_p8 = pneg %p2093_p7 }
 0x756   : > { %p2099_p12 = pnand %p2098_p11, %p2094_p8 }
 0x758   : > { %2102 = shalt.err (!%p2099_p12)
}
 0x759   : > { %1959 = dma.vmem_to_hbm [thread:$0]  (%p2245_p5), %s1547_s26, 64, %s1544_s10, %s1520_s12   ;;  %v1499_v51 = vmul.f32 %v1498_v12, %v2278_v10  ;;  %v2076_v52 = vpop.eup %2075 }
 0x75a   : > { %s1746_s14 = sshll.u32 %s2228_s25, 7  ;;  %s246_s15 = scalar_lea.vmem [#allocation2], %s1641_s28 }
 0x75b   : > { %s1533_s16 = sshll.u32 %s246_s15, 4  ;;  %v1503_v57 = vmul.f32 %v2076_v52, %v1499_v51  ;;  %s1531_s13 = scalar_lea.hbm %s2667_s5, %s1746_s14  ;;  %s1534_s16 = int_to_ptr.vmem [resolvable:$true] %s1533_s16 }
 0x75c   : > { %s1515_s19 = scalar_lea.sflag [#allocation3], %s2439_s11  ;;  %s2103_s20 = scalar_lea.vmem %s1534_s16, 128 }
 0x75d   : > { %v1504_v59 = vadd.f32 %v1503_v57, %v2561_v58  ;;  %p2104_p13 = scmp.ne.s32.totalorder %s1534_s16, %s2103_s20  ;;  %s2171_s26 = smov [#allocation2]  }
 0x75e   : > { %s2107_s25 = sshll.u32 %s2171_s26, 4  ;;  %s2108_s25 = int_to_ptr.vmem [resolvable:$false] %s2107_s25 }
 0x75f   : > { %1513 = vst [vmem:[%s246_s15] sm:$0xff] %v1504_v59  ;;  %p2105_p0 = pnand %p2104_p13, %p2245_p5  ;;  %s2109_s28 = scalar_lea.vmem %s2108_s25, 256 }
 0x760   : > { %p2110_p2 = scmp.lt.s32.totalorder %s1534_s16, %s2108_s25  ;;  %p2111_p3 = scmp.lt.s32.totalorder %s2109_s28, %s2103_s20 }
 0x761   : > { %p2106_p1 = pneg %p2105_p0 }
 0x762   : > { %p2112_p4 = por %p2111_p3, %p2110_p2 }
 0x764   : > { %p2113_p7 = pnand %p2112_p4, %p2106_p1 }
 0x766   : > { %2116 = shalt.err (!%p2113_p7)
}
 0x767   : > { %s2117_s10 = scalar_lea.hbm %s1531_s13, 128  ;;  %s2121_s29 = scalar_lea.hbm %s2667_s5, 256 }
 0x768   : > { %p2118_p8 = scmp.ne.s32.totalorder %s1531_s13, %s2117_s10  ;;  %p2122_p11 = scmp.lt.s32.totalorder %s1531_s13, %s2667_s5 }
 0x769   : > { %p2123_p12 = scmp.lt.s32.totalorder %s2121_s29, %s2117_s10 }
 0x76a   : > { %p2119_p9 = pnand %p2118_p8, %p2245_p5 }
 0x76b   : > { %p2124_p13 = por %p2123_p12, %p2122_p11 }
 0x76c   : > { %p2120_p10 = pneg %p2119_p9 }
 0x76e   : > { %p2125_p0 = pnand %p2124_p13, %p2120_p10 }
 0x770   : > { %2128 = shalt.err (!%p2125_p0)
}
 0x771   : > { %1958 = dma.vmem_to_hbm [thread:$0]  (%p2245_p5), %s1534_s16, 128, %s1531_s13, %s1515_s19  }
 0x772 PF: > { %p1969_p1 = scmp.ge.s32.totalorder %s2167_s24, 2  ;;  %s1558_s15 = sand.u32 1, %s2155_s21  }
 0x773   : > { %s1559_s17 = scalar_lea.sflag [#allocation3], %s1558_s15 }
 0x774   : > { %p1963_p2 = pnand %p1969_p1, %p2249_p6 }
 0x776   : > { %p1964_p3 = pneg %p1963_p2 }
 0x778   : > { %2146 = dma.done.wait (%p1964_p3), %s1559_s17, 128  }
 0x779   : > { %2148 = vsyncadd (%p1964_p3), %s1559_s17, 4294967168  ;;  %s1568_s18 = scalar_lea.sflag [#allocation5], %s1558_s15 }
 0x77a   : > { %2150 = dma.done.wait (%p1964_p3), %s1568_s18, 64  }
 0x77b   : > { %2152 = vsyncadd (%p1964_p3), %s1568_s18, 4294967232  ;;  %p20_p5 = scmp.ge.s32.totalorder %s2232_s27, 4   ;;  %s2671_s21 = smov %s2159_s22 }
 0x77c   : > { %s2672_s22 = smov %s2163_s23  ;;  %s2673_s23 = smov %s2243_s30 }
 0x77d   : > { %s2674_s24 = smov %s2232_s27  ;;  %22 = sbr.rel (!%p20_p5) target bundleno = 5 (0x5), region = 104 }
 0x782   :  { %1573 = vsyncpa [#allocation3], 1 }
 0x783   :  { %1575 = vsyncpa [#allocation3 + $0x1], 1 }
 0x784   :  { %1576 = vsyncpa [#allocation5], 1 }
 0x785   :  { %1578 = vsyncpa [#allocation5 + $0x1], 1 }

</bundles_post_ra>
